<compile_context>
chip_gen: v7x
topology: tpu7x:2x2x1
jax: 0.10.0
libtpu: 0.0.40
codegen_flags: <defaults>
</compile_context>

<pallas_src>
import jax
import jax.numpy as jnp
from jax import lax
from jax.experimental import pallas as pl
from jax.experimental.pallas import tpu as pltpu


# ----------------------------- Pallas kernel ------------------------------- #
def _patch_embed_kernel(x_ref, w_ref, b_ref, o_ref):
    # x_ref: [Mp, K] patches, w_ref: [Np, K] projection (PyTorch [out, k] layout,
    # zero-padded on out), b_ref: [1, Np] bias (zero-padded).
    # Contract K of x with K of w -> [Mp, Np]; f32 accumulation on the MXU.
    acc = lax.dot_general(
        x_ref[...],
        w_ref[...],
        dimension_numbers=(((1,), (1,)), ((), ())),
        preferred_element_type=jnp.float32,
    )
    o_ref[...] = (acc + b_ref[...]).astype(o_ref.dtype)


def _round_up(x, m):
    return ((x + m - 1) // m) * m


def patch_embed_forward(x, weight, bias, *, patch_size=16):
    """x: [B, 1, L] (NCL).  weight: [num_features, 1, patch_size] (PyTorch Conv1d
    layout).  bias: [num_features].  Returns [B, P, num_features]."""
    B, C, L = x.shape
    assert C == 1, "PatchEmbed defaults use in_chans=1"
    N = weight.shape[0]
    K = patch_size
    P = (L - patch_size) // patch_size + 1  # conv output length (stride == kernel)
    M = B * P

    # Padded (lane/sublane aligned) problem sizes.
    Mp = _round_up(M, 8)     # f32 sublane multiple -> no masked sublane stores
    Np = _round_up(N, 128)   # full 128-lane output tiles -> dense vst

    # ---- glue (plain JAX): patch extraction + zero padding, no transpose ----
    x_patches = x[:, 0, : P * patch_size].reshape(M, K)            # [M, K]
    x_pad = jnp.pad(x_patches, ((0, Mp - M), (0, 0)))              # [Mp, K]
    w_nk = jnp.pad(weight[:, 0, :], ((0, Np - N), (0, 0)))         # [Np, K]
    b_pad = jnp.pad(bias, (0, Np - N)).reshape(1, Np)              # [1, Np]

    flops = 2 * Mp * K * Np
    bytes_accessed = 4 * (Mp * K + Np * K + Np + Mp * Np)

    out_pad = pl.pallas_call(
        _patch_embed_kernel,
        out_shape=jax.ShapeDtypeStruct((Mp, Np), x.dtype),
        # Single full-array block per operand; block_shape == array dims
        # satisfies the (8,128) rule and everything fits in VMEM at once.
        in_specs=[
            pl.BlockSpec((Mp, K), lambda: (0, 0)),
            pl.BlockSpec((Np, K), lambda: (0, 0)),
            pl.BlockSpec((1, Np), lambda: (0, 0)),
        ],
        out_specs=pl.BlockSpec((Mp, Np), lambda: (0, 0)),
        cost_estimate=pl.CostEstimate(
            flops=flops, transcendentals=0, bytes_accessed=bytes_accessed
        ),
        compiler_params=pltpu.CompilerParams(),
    )(x_pad, w_nk, b_pad)

    # Slice away padding and restore the PyTorch output layout [B, P, N].
    return out_pad[:M, :N].reshape(B, P, N)


# ------------------------------- reference --------------------------------- #
def patch_embed_reference(x, weight, bias, *, patch_size=16):
    B, _, L = x.shape
    N = weight.shape[0]
    P = (L - patch_size) // patch_size + 1
    xp = x[:, 0, : P * patch_size].reshape(B, P, patch_size)
    return jnp.einsum("bpk,nk->bpn", xp, weight[:, 0, :]) + bias[None, None, :]


# --------------------------------- main ------------------------------------ #
if __name__ == "__main__":
    # Module defaults: in_chans=1, num_features=65, patch_size=16, input_shape=[1, 1040]
    B, C, L = 2, 1, 1040
    patch_size, num_features = 16, 65

    key = jax.random.PRNGKey(0)
    kx, kw, kb = jax.random.split(key, 3)

    x = jax.random.normal(kx, (B, C, L), dtype=jnp.float32)
    # Deterministic synthetic Conv1d params (PyTorch layout [out, in, kernel]).
    weight = 0.02 * jax.random.normal(kw, (num_features, C, patch_size), dtype=jnp.float32)
    bias = 0.01 * jax.random.normal(kb, (num_features,), dtype=jnp.float32)

    out = patch_embed_forward(x, weight, bias, patch_size=patch_size)
    out = jax.block_until_ready(out)

    ref = patch_embed_reference(x, weight, bias, patch_size=patch_size)
    P = (L - patch_size) // patch_size + 1
    assert out.shape == (B, P, num_features), out.shape
    assert jnp.allclose(out, ref, atol=1e-5, rtol=1e-5), "mismatch vs reference"

    # norm_layer=None -> nn.Identity(); nothing to apply.
    # self.con2 is defined in the module but never used in forward(); not implemented.
    print("KERNEL_OK")
</pallas_src>

<mosaic_0001>
module attributes {stable_mosaic.version = 11 : i64} {
  func.func @_patch_embed_kernel(%arg0: memref<136x16xf32, #tpu.memory_space<vmem>>, %arg1: memref<128x16xf32, #tpu.memory_space<vmem>>, %arg2: memref<1x128xf32, #tpu.memory_space<vmem>>, %arg3: memref<136x128xf32, #tpu.memory_space<vmem>>) attributes {dimension_semantics = [], scalar_prefetch = 0 : i64, scratch_operands = 0 : i64, tpu.core_type = #tpu.core_type<tc>} {
    %c0 = arith.constant 0 : index
    %c0_0 = arith.constant 0 : index
    %0 = vector.load %arg0[%c0, %c0_0] : memref<136x16xf32, #tpu.memory_space<vmem>>, vector<136x16xf32>
    %c0_1 = arith.constant 0 : index
    %c0_2 = arith.constant 0 : index
    %1 = vector.load %arg1[%c0_1, %c0_2] : memref<128x16xf32, #tpu.memory_space<vmem>>, vector<128x16xf32>
    %cst = arith.constant dense<0.000000e+00> : vector<136x128xf32>
    %2 = tpu.matmul %0, %1, %cst {dimension_numbers = #tpu.dot_dimension_numbers<[1], [1], [0], [0], [0, 0, 1, 0], [], []>} : vector<136x16xf32>, vector<128x16xf32>, vector<136x128xf32> -> vector<136x128xf32>
    %c0_3 = arith.constant 0 : index
    %c0_4 = arith.constant 0 : index
    %3 = vector.load %arg2[%c0_3, %c0_4] : memref<1x128xf32, #tpu.memory_space<vmem>>, vector<1x128xf32>
    %4 = vector.broadcast %3 : vector<1x128xf32> to vector<136x128xf32>
    %5 = arith.addf %2, %4 : vector<136x128xf32>
    %c0_5 = arith.constant 0 : index
    %c0_6 = arith.constant 0 : index
    %6 = vector.load %arg3[%c0_5, %c0_6] : memref<136x128xf32, #tpu.memory_space<vmem>>, vector<136x128xf32>
    tpu.vector_store %arg3[%c0_5, %c0_6], %5 {strides = array<i32>} : memref<136x128xf32, #tpu.memory_space<vmem>>, vector<136x128xf32>,
    return
  }
}

</mosaic_0001>

<bundles_post_ra>
// kernel: tpu_custom_call.1
= control target key start
LH: loop header
LB: loop body
LE: loop exit
PB: predicated region body
PF: predicated region fallthrough
CT: control target
= control target key end

     0   :  { %vm55_vm0 = vcmask 130048   ;;  %v566_v2 = vmov 0.0|0.0   ;;  %vm567_vm2 = vmmov 0   ;;  %v568_v5 = vmov 0.0   ;;  %s814_s0 = inlined_call_operand.vmem [shape: f32[136,16], index: 0, kind: input, shape index: {}]   ;;  %s815_s1 = inlined_call_operand.vmem [shape: f32[128,16], index: 1, kind: input, shape index: {}]   ;;  %s816_s2 = inlined_call_operand.vmem [shape: f32[1,128], index: 2, kind: input, shape index: {}]   ;;  %s817_s3 = inlined_call_operand.hbm [shape: f32[136,128], index: 3, kind: output, shape index: {}]  }
   0x1   :  { %v32_v0 = vld [vmem:[%s815_s1] sm:$0xff]  ;;  %v33_v1 = vld [vmem:[%s815_s1 + $0x8] sm:$0xff]  ;;  %488 = vmatprep.subr.bf16.mxu0 %v566_v2  ;;  %vm600_vm1 = vmpackc.low %vm55_vm0, %vm55_vm0  ;;  %520 = vmatprep.subr.bf16.mxu1 %v566_v2 }
   0x2   :  { %v489_v3 = vpack.c.bf16 %v33_v1, %v32_v0  ;;  %437 = vmatprep.mubr.msk.f32.mxu0 %vm567_vm2, %v568_v5  ;;  %464 = vmatprep.mubr.msk.f32.mxu1 %vm567_vm2, %v568_v5  ;;  %v34_v6 = vld [vmem:[%s815_s1 + $0x10] sm:$0xff]  ;;  %v35_v7 = vld [vmem:[%s815_s1 + $0x18] sm:$0xff] }
   0x3   :  { %v493_v8 = vpack.c.bf16 %v35_v7, %v34_v6 }
   0x4   :  { %491 = vmatpush3.bf16.xpose.msk.msra.mxu0 %vm600_vm1, %v489_v3  ;;  %528 = vmatpush3.bf16.xpose.msk.msra.mxu1 %vm600_vm1, %v489_v3 }
   0x5   :  { %492 = vmatprep.subr.bf16.mxu0 %v566_v2  ;;  %521 = vmatprep.subr.bf16.mxu1 %v566_v2 }
   0xc   :  { %495 = vmatpush3.bf16.xpose.msk.msra.mxu0 %vm600_vm1, %v493_v8  ;;  %529 = vmatpush3.bf16.xpose.msk.msra.mxu1 %vm600_vm1, %v493_v8 }
   0xd   :  { %8 = vsyncpa [#allocation3], 0  ;;  %496 = vmatprep.subr.bf16.mxu0 %v566_v2  ;;  %v36_v9 = vld [vmem:[%s815_s1 + $0x20] sm:$0xff]  ;;  %v37_v10 = vld [vmem:[%s815_s1 + $0x28] sm:$0xff]  ;;  %522 = vmatprep.subr.bf16.mxu1 %v566_v2 }
   0xe   :  { %v497_v11 = vpack.c.bf16 %v37_v10, %v36_v9  ;;  %v38_v12 = vld [vmem:[%s815_s1 + $0x30] sm:$0xff]  ;;  %v39_v13 = vld [vmem:[%s815_s1 + $0x38] sm:$0xff]  ;;  %v40_v15 = vld [vmem:[%s815_s1 + $0x40] sm:$0xff] }
   0xf   :  { %v501_v14 = vpack.c.bf16 %v39_v13, %v38_v12  ;;  %v41_v16 = vld [vmem:[%s815_s1 + $0x48] sm:$0xff]  ;;  %v42_v18 = vld [vmem:[%s815_s1 + $0x50] sm:$0xff]  ;;  %v43_v19 = vld [vmem:[%s815_s1 + $0x58] sm:$0xff] }
  0x10   :  { %v505_v17 = vpack.c.bf16 %v41_v16, %v40_v15  ;;  %v509_v20 = vpack.c.bf16 %v43_v19, %v42_v18  ;;  %v44_v21 = vld [vmem:[%s815_s1 + $0x60] sm:$0xff]  ;;  %v45_v22 = vld [vmem:[%s815_s1 + $0x68] sm:$0xff]  ;;  %v46_v24 = vld [vmem:[%s815_s1 + $0x70] sm:$0xff] }
  0x11   :  { %v513_v23 = vpack.c.bf16 %v45_v22, %v44_v21  ;;  %v47_v25 = vld [vmem:[%s815_s1 + $0x78] sm:$0xff]  ;;  %v15_v27 = vld [vmem:[%s814_s0] sm:$0xff]  ;;  %v24_v28 = vld [vmem:[%s814_s0 + $0x48] sm:$0xff] }
  0x12   :  { %v517_v26 = vpack.c.bf16 %v47_v25, %v46_v24  ;;  %v16_v29 = vld [vmem:[%s814_s0 + $0x8] sm:$0xff]  ;;  %v25_v30 = vld [vmem:[%s814_s0 + $0x50] sm:$0xff]  ;;  %v26_v32 = vld [vmem:[%s814_s0 + $0x58] sm:$0xff] }
  0x13   :  { %v17_v31 = vld [vmem:[%s814_s0 + $0x10] sm:$0xff]  ;;  %v18_v33 = vld [vmem:[%s814_s0 + $0x18] sm:$0xff]  ;;  %v27_v34 = vld [vmem:[%s814_s0 + $0x60] sm:$0xff] }
  0x14   :  { %499 = vmatpush3.bf16.xpose.msk.msra.mxu0 %vm600_vm1, %v497_v11  ;;  %530 = vmatpush3.bf16.xpose.msk.msra.mxu1 %vm600_vm1, %v497_v11  ;;  %v19_v35 = vld [vmem:[%s814_s0 + $0x20] sm:$0xff]  ;;  %v28_v36 = vld [vmem:[%s814_s0 + $0x68] sm:$0xff]  ;;  %v29_v38 = vld [vmem:[%s814_s0 + $0x70] sm:$0xff] }
  0x15   :  { %500 = vmatprep.subr.bf16.mxu0 %v566_v2  ;;  %523 = vmatprep.subr.bf16.mxu1 %v566_v2  ;;  %v20_v37 = vld [vmem:[%s814_s0 + $0x28] sm:$0xff]  ;;  %v21_v39 = vld [vmem:[%s814_s0 + $0x30] sm:$0xff]  ;;  %v30_v40 = vld [vmem:[%s814_s0 + $0x78] sm:$0xff] }
  0x16   :  { %v22_v41 = vld [vmem:[%s814_s0 + $0x38] sm:$0xff]  ;;  %v31_v42 = vld [vmem:[%s814_s0 + $0x80] sm:$0xff] }
  0x17   :  { %v23_v43 = vld [vmem:[%s814_s0 + $0x40] sm:$0xff]  ;;  %s569_s0 = smov [#allocation2]  }
  0x18   :  { %v783_v44 = vld [vmem:[%s816_s2] ss:$0 sm:$0xff]  ;;  %s327_s2 = sshll.u32 %s569_s0, 4  ;;  %s328_s2 = int_to_ptr.vmem [resolvable:$true] %s327_s2 }
  0x19   :  { %s542_s24 = scalar_lea.vmem %s328_s2, 2176  ;;  %p547_p1 = scmp.lt.s32.totalorder %s328_s2, %s328_s2 }
  0x1a   :  { %p543_p0 = scmp.ne.s32.totalorder %s328_s2, %s542_s24  ;;  %p548_p2 = scmp.lt.s32.totalorder %s542_s24, %s542_s24 }
  0x1c   :  { %503 = vmatpush3.bf16.xpose.msk.msra.mxu0 %vm600_vm1, %v501_v14  ;;  %531 = vmatpush3.bf16.xpose.msk.msra.mxu1 %vm600_vm1, %v501_v14  ;;  %p549_p3 = por %p548_p2, %p547_p1 }
  0x1d   :  { %504 = vmatprep.subr.bf16.mxu0 %v566_v2  ;;  %524 = vmatprep.subr.bf16.mxu1 %v566_v2 }
  0x1e   :  { %p550_p4 = pnand %p549_p3, %p543_p0 }
  0x24   :  { %507 = vmatpush3.bf16.xpose.msk.msra.mxu0 %vm600_vm1, %v505_v17  ;;  %532 = vmatpush3.bf16.xpose.msk.msra.mxu1 %vm600_vm1, %v505_v17 }
  0x25   :  { %508 = vmatprep.subr.bf16.mxu0 %v566_v2  ;;  %525 = vmatprep.subr.bf16.mxu1 %v566_v2 }
  0x2c   :  { %511 = vmatpush3.bf16.xpose.msk.msra.mxu0 %vm600_vm1, %v509_v20  ;;  %533 = vmatpush3.bf16.xpose.msk.msra.mxu1 %vm600_vm1, %v509_v20 }
  0x2d   :  { %512 = vmatprep.subr.bf16.mxu0 %v566_v2  ;;  %526 = vmatprep.subr.bf16.mxu1 %v566_v2 }
  0x34   :  { %515 = vmatpush3.bf16.xpose.msk.msra.mxu0 %vm600_vm1, %v513_v23  ;;  %534 = vmatpush3.bf16.xpose.msk.msra.mxu1 %vm600_vm1, %v513_v23 }
  0x35   :  { %516 = vmatprep.subr.bf16.mxu0 %v566_v2  ;;  %527 = vmatprep.subr.bf16.mxu1 %v566_v2 }
  0x3c   :  { %519 = vmatpush3.bf16.xpose.msk.msra.mxu0 %vm600_vm1, %v517_v26  ;;  %535 = vmatpush3.bf16.xpose.msk.msra.mxu1 %vm600_vm1, %v517_v26 }
  0x43   :  { %438 = vmatmul.mubr.msk.f32.vlgmr.msra.gmra.mrb[0].mxu0 %vm55_vm0, %v15_v27  ;;  %465 = vmatmul.mubr.msk.f32.vlgmr.msra.gmra.mrb[0].mxu1 %vm55_vm0, %v24_v28 }
  0x44   :  { %440 = vmatprep.mubr.msk.f32.mxu0 %vm567_vm2, %v568_v5  ;;  %467 = vmatprep.mubr.msk.f32.mxu1 %vm567_vm2, %v568_v5 }
  0x47   :  { %441 = vmatmul.mubr.msk.f32.gmra.mrb[2].mxu0 %vm55_vm0, %v16_v29  ;;  %468 = vmatmul.mubr.msk.f32.gmra.mrb[2].mxu1 %vm55_vm0, %v25_v30 }
  0x48   :  { %443 = vmatprep.mubr.msk.f32.mxu0 %vm567_vm2, %v568_v5  ;;  %470 = vmatprep.mubr.msk.f32.mxu1 %vm567_vm2, %v568_v5 }
  0x4b   :  { %444 = vmatmul.mubr.msk.f32.gmra.mrb[4].mxu0 %vm55_vm0, %v17_v31  ;;  %471 = vmatmul.mubr.msk.f32.gmra.mrb[4].mxu1 %vm55_vm0, %v26_v32 }
  0x4c   :  { %446 = vmatprep.mubr.msk.f32.mxu0 %vm567_vm2, %v568_v5  ;;  %473 = vmatprep.mubr.msk.f32.mxu1 %vm567_vm2, %v568_v5 }
  0x4f   :  { %447 = vmatmul.mubr.msk.f32.gmra.mrb[6].mxu0 %vm55_vm0, %v18_v33  ;;  %474 = vmatmul.mubr.msk.f32.gmra.mrb[6].mxu1 %vm55_vm0, %v27_v34 }
  0x50   :  { %449 = vmatprep.mubr.msk.f32.mxu0 %vm567_vm2, %v568_v5  ;;  %476 = vmatprep.mubr.msk.f32.mxu1 %vm567_vm2, %v568_v5 }
  0x53   :  { %450 = vmatmul.mubr.msk.f32.gmra.mrb[8].mxu0 %vm55_vm0, %v19_v35  ;;  %477 = vmatmul.mubr.msk.f32.gmra.mrb[8].mxu1 %vm55_vm0, %v28_v36 }
  0x54   :  { %452 = vmatprep.mubr.msk.f32.mxu0 %vm567_vm2, %v568_v5  ;;  %479 = vmatprep.mubr.msk.f32.mxu1 %vm567_vm2, %v568_v5 }
  0x57   :  { %453 = vmatmul.mubr.msk.f32.gmra.mrb[10].mxu0 %vm55_vm0, %v20_v37  ;;  %480 = vmatmul.mubr.msk.f32.gmra.mrb[10].mxu1 %vm55_vm0, %v29_v38 }
  0x58   :  { %455 = vmatprep.mubr.msk.f32.mxu0 %vm567_vm2, %v568_v5  ;;  %482 = vmatprep.mubr.msk.f32.mxu1 %vm567_vm2, %v568_v5 }
  0x5b   :  { %456 = vmatmul.mubr.msk.f32.gmra.mrb[12].mxu0 %vm55_vm0, %v21_v39  ;;  %483 = vmatmul.mubr.msk.f32.gmra.mrb[12].mxu1 %vm55_vm0, %v30_v40 }
  0x5c   :  { %458 = vmatprep.mubr.msk.f32.mxu0 %vm567_vm2, %v568_v5  ;;  %485 = vmatprep.mubr.msk.f32.mxu1 %vm567_vm2, %v568_v5 }
  0x5f   :  { %459 = vmatmul.mubr.msk.f32.gmra.mrb[14].mxu0 %vm55_vm0, %v22_v41  ;;  %486 = vmatmul.mubr.msk.f32.gmra.mrb[14].mxu1 %vm55_vm0, %v31_v42 }
  0x60   :  { %461 = vmatprep.mubr.msk.f32.mxu0 %vm567_vm2, %v568_v5 }
  0x63   :  { %462 = vmatmul.mubr.msk.f32.gmra.mrb[16].mxu0 %vm55_vm0, %v23_v43 }
 0x116   :  { %v221_v45 = vpop.f32.mrb[0].mxu0  ;;  %v266_v46 = vpop.f32.mrb[0].mxu1 }
 0x117   :  { %v222_v47 = vadd.f32 %v783_v44, %v221_v45  ;;  %v439_v48 = vpop.f32.mrb[1].mxu0  ;;  %v267_v49 = vadd.f32 %v783_v44, %v266_v46  ;;  %v466_v50 = vpop.f32.mrb[1].mxu1 }
 0x119   :  { %305 = vst [vmem:[#allocation2] sm:$0xff] %v222_v47  ;;  %314 = vst [vmem:[#allocation2 + $0x48] sm:$0xff] %v267_v49 }
 0x11a   :  { %v226_v51 = vpop.f32.mrb[2].mxu0  ;;  %v271_v52 = vpop.f32.mrb[2].mxu1 }
 0x11b   :  { %v227_v53 = vadd.f32 %v783_v44, %v226_v51  ;;  %v442_v54 = vpop.f32.mrb[3].mxu0  ;;  %v272_v55 = vadd.f32 %v783_v44, %v271_v52  ;;  %v469_v56 = vpop.f32.mrb[3].mxu1 }
 0x11d   :  { %306 = vst [vmem:[#allocation2 + $0x8] sm:$0xff] %v227_v53  ;;  %315 = vst [vmem:[#allocation2 + $0x50] sm:$0xff] %v272_v55 }
 0x11e   :  { %v231_v57 = vpop.f32.mrb[4].mxu0  ;;  %v276_v58 = vpop.f32.mrb[4].mxu1 }
 0x11f   :  { %v232_v59 = vadd.f32 %v783_v44, %v231_v57  ;;  %v445_v60 = vpop.f32.mrb[5].mxu0  ;;  %v277_v61 = vadd.f32 %v783_v44, %v276_v58  ;;  %v472_v62 = vpop.f32.mrb[5].mxu1 }
 0x121   :  { %307 = vst [vmem:[#allocation2 + $0x10] sm:$0xff] %v232_v59  ;;  %316 = vst [vmem:[#allocation2 + $0x58] sm:$0xff] %v277_v61 }
 0x122   :  { %v236_v63 = vpop.f32.mrb[6].mxu0  ;;  %v281_v0 = vpop.f32.mrb[6].mxu1 }
 0x123   :  { %v237_v1 = vadd.f32 %v783_v44, %v236_v63  ;;  %v448_v2 = vpop.f32.mrb[7].mxu0  ;;  %v282_v3 = vadd.f32 %v783_v44, %v281_v0  ;;  %v475_v4 = vpop.f32.mrb[7].mxu1 }
 0x125   :  { %308 = vst [vmem:[#allocation2 + $0x18] sm:$0xff] %v237_v1  ;;  %317 = vst [vmem:[#allocation2 + $0x60] sm:$0xff] %v282_v3 }
 0x126   :  { %v241_v5 = vpop.f32.mrb[8].mxu0  ;;  %v286_v6 = vpop.f32.mrb[8].mxu1 }
 0x127   :  { %v242_v7 = vadd.f32 %v783_v44, %v241_v5  ;;  %v451_v8 = vpop.f32.mrb[9].mxu0  ;;  %v287_v9 = vadd.f32 %v783_v44, %v286_v6  ;;  %v478_v10 = vpop.f32.mrb[9].mxu1 }
 0x129   :  { %309 = vst [vmem:[#allocation2 + $0x20] sm:$0xff] %v242_v7  ;;  %318 = vst [vmem:[#allocation2 + $0x68] sm:$0xff] %v287_v9 }
 0x12a   :  { %v246_v11 = vpop.f32.mrb[10].mxu0  ;;  %v291_v12 = vpop.f32.mrb[10].mxu1 }
 0x12b   :  { %v247_v13 = vadd.f32 %v783_v44, %v246_v11  ;;  %v454_v14 = vpop.f32.mrb[11].mxu0  ;;  %v292_v15 = vadd.f32 %v783_v44, %v291_v12  ;;  %v481_v16 = vpop.f32.mrb[11].mxu1 }
 0x12d   :  { %310 = vst [vmem:[#allocation2 + $0x28] sm:$0xff] %v247_v13  ;;  %319 = vst [vmem:[#allocation2 + $0x70] sm:$0xff] %v292_v15 }
 0x12e   :  { %v251_v17 = vpop.f32.mrb[12].mxu0  ;;  %v296_v18 = vpop.f32.mrb[12].mxu1 }
 0x12f   :  { %v252_v19 = vadd.f32 %v783_v44, %v251_v17  ;;  %v457_v20 = vpop.f32.mrb[13].mxu0  ;;  %v297_v21 = vadd.f32 %v783_v44, %v296_v18  ;;  %v484_v22 = vpop.f32.mrb[13].mxu1 }
 0x131   :  { %311 = vst [vmem:[#allocation2 + $0x30] sm:$0xff] %v252_v19  ;;  %320 = vst [vmem:[#allocation2 + $0x78] sm:$0xff] %v297_v21 }
 0x132   :  { %v256_v23 = vpop.f32.mrb[14].mxu0  ;;  %v301_v24 = vpop.f32.mrb[14].mxu1 }
 0x133   :  { %v257_v25 = vadd.f32 %v783_v44, %v256_v23  ;;  %v460_v26 = vpop.f32.mrb[15].mxu0  ;;  %v302_v27 = vadd.f32 %v783_v44, %v301_v24  ;;  %v487_v28 = vpop.f32.mrb[15].mxu1 }
 0x135   :  { %312 = vst [vmem:[#allocation2 + $0x38] sm:$0xff] %v257_v25  ;;  %321 = vst [vmem:[#allocation2 + $0x80] sm:$0xff] %v302_v27 }
 0x136   :  { %v261_v29 = vpop.f32.mrb[16].mxu0 }
 0x137   :  { %v262_v30 = vadd.f32 %v783_v44, %v261_v29  ;;  %v463_v31 = vpop.f32.mrb[17].mxu0 }
 0x139   :  { %313 = vst [vmem:[#allocation2 + $0x40] sm:$0xff] %v262_v30 }
 0x13a   :  { %553 = shalt.err (!%p550_p4)
}
 0x13b   :  { %s554_s27 = scalar_lea.hbm %s817_s3, 2176 }
 0x13c   :  { %p555_p5 = scmp.ne.s32.totalorder %s817_s3, %s554_s27  ;;  %p558_p6 = scmp.lt.u32.totalorder %s554_s27, %s817_s3 }
 0x13e   :  { %p560_p7 = pnand %p558_p6, %p555_p5 }
 0x140   :  { %563 = shalt.err (!%p560_p7)
}
 0x141   :  { %s570_s5 = smov 128   ;;  %s571_s6 = smov 8  }
 0x142   :  { %333 = dma.vmem_to_hbm [thread:$0]  %s328_s2, 2176, %s817_s3, [#allocation3], %s570_s5, %s570_s5, %s571_s6  }
 0x143   :  { %564 = dma.done.wait [#allocation3], 2176  }
 0x144   :  { %565 = vsyncadd [#allocation3], 4294965120 }
 0x145   :  { %337 = vsyncpa [#allocation3], 1 }

</bundles_post_ra>
